<compile_context>
chip_gen: v6e
topology: v6e:2x2x1
jax: 0.10.0
libtpu: 0.0.40
codegen_flags: <defaults>
</compile_context>

<pallas_src>
import functools

import jax
import jax.numpy as jnp
from jax.experimental import pallas as pl
from jax.experimental.pallas import tpu as pltpu

IN_FEATS = 2
H1, H2, H3, HOUT = 50, 50, 25, 1


def _round_up(n, m):
    return ((n + m - 1) // m) * m


def _make_kernel(chunk, n_chunks, mxu_dtype):
    """Kernel over one (1, TB) batch block, processed in `n_chunks` chunks."""

    def kernel(t_ref, x_ref,
               w1_ref, b1_ref,
               w2_ref, b2_ref,
               w3_ref, b3_ref,
               w4t_ref, b4_ref,
               out_ref):
        # Hoist weight loads / casts out of the chunk loop (weights are tiny
        # and resident; JAX does not CSE broadcasts inside loops).
        w1_t = w1_ref[:, 0:1]                    # (H1, 1)
        w1_x = w1_ref[:, 1:2]                    # (H1, 1)
        b1 = b1_ref[...]                         # (H1, 1)
        w2 = w2_ref[...].astype(mxu_dtype)       # (H2, H1)
        b2 = b2_ref[...]
        w3 = w3_ref[...].astype(mxu_dtype)       # (H3, H2)
        b3 = b3_ref[...]
        w4t = w4t_ref[...]                       # (H3, HOUT)
        b4 = b4_ref[...]                         # (HOUT, 1)

        def body(j, carry):
            off = pl.multiple_of(j * chunk, 128)
            t_row = t_ref[:, pl.ds(off, chunk)]  # (1, chunk)
            x_row = x_ref[:, pl.ds(off, chunk)]  # (1, chunk)

            # Layer 1 on the VPU: two broadcast FMAs instead of a K=2 matmul.
            h = jnp.tanh(w1_t * t_row + w1_x * x_row + b1)          # (H1, chunk)

            # Layers 2-3 on the MXU (optionally bf16 operands, f32 accumulate).
            h = jnp.tanh(jnp.dot(w2, h.astype(mxu_dtype),
                                 preferred_element_type=jnp.float32) + b2)
            h = jnp.tanh(jnp.dot(w3, h.astype(mxu_dtype),
                                 preferred_element_type=jnp.float32) + b3)

            # Output layer (25 -> 1): broadcast-mul + cross-sublane reduce,
            # lane-dense (1, chunk) store.
            out_ref[:, pl.ds(off, chunk)] = (
                jnp.sum(h * w4t, axis=0, keepdims=True) + b4)
            return carry

        jax.lax.fori_loop(0, n_chunks, body, 0, unroll=True)

    return kernel


def dnn_forward(T, x, params, *, batch_tile=2048, chunk=512,
                mxu_dtype=jnp.float32):
    """Pallas implementation of DNN.forward(T, x) -> (N,) output."""
    w1, b1, w2, b2, w3, b3, w4, b4 = params
    N = T.shape[0]

    # Batch tile: big enough to amortize per-grid-step overhead, but capped so
    # the grid keeps >= 2 steps (v7x shards the "parallel" grid axis across
    # its two TensorCores).  Multiple of 128 lanes; multiple of `chunk` when
    # it exceeds one chunk so the inner loop tiles exactly.
    TB = min(batch_tile, _round_up(pl.cdiv(N, 2), 128))
    if TB > chunk:
        TB = _round_up(TB, chunk)
    chunk_lanes = min(chunk, TB)
    n_chunks = TB // chunk_lanes
    assert TB == n_chunks * chunk_lanes
    grid = pl.cdiv(N, TB)

    # Glue for torch.cat((T.unsqueeze(1), x.unsqueeze(1)), axis=1): keep the
    # two features as separate (1, N) rows (free reshape, no stack/pad copy).
    # The last partial block reads garbage lanes (per-lane compute only) and
    # its output lanes are masked on writeback by Pallas.
    t2 = T.reshape(1, N).astype(jnp.float32)
    x2 = x.reshape(1, N).astype(jnp.float32)

    f32 = lambda a: jnp.asarray(a, jnp.float32)
    col = lambda b: f32(b).reshape(-1, 1)
    full = lambda shape: pl.BlockSpec(shape, lambda i: (0, 0))

    out = pl.pallas_call(
        _make_kernel(chunk_lanes, n_chunks, mxu_dtype),
        out_shape=jax.ShapeDtypeStruct((HOUT, N), jnp.float32),
        grid_spec=pltpu.PrefetchScalarGridSpec(
            num_scalar_prefetch=0,
            grid=(grid,),
            in_specs=[
                pl.BlockSpec((1, TB), lambda i: (0, i)),   # T row
                pl.BlockSpec((1, TB), lambda i: (0, i)),   # x row
                full((H1, IN_FEATS)), full((H1, 1)),
                full((H2, H1)),       full((H2, 1)),
                full((H3, H2)),       full((H3, 1)),
                full((H3, HOUT)),     full((HOUT, 1)),
            ],
            out_specs=pl.BlockSpec((HOUT, TB), lambda i: (0, i)),
        ),
        compiler_params=pltpu.CompilerParams(
            dimension_semantics=("parallel",),
            vmem_limit_bytes=32 * 1024 * 1024),
    )(t2, x2,
      f32(w1), col(b1),
      f32(w2), col(b2),
      f32(w3), col(b3),
      f32(w4).T, col(b4))

    # Glue: torch.reshape(output, (-1,)).
    return out.reshape(-1)


def init_params(key):
    """Deterministic parameter init; PyTorch nn.Linear layout (out, in)."""
    keys = jax.random.split(key, 8)

    def linear(kw, kb, fan_in, fan_out):
        bound = 1.0 / jnp.sqrt(jnp.float32(fan_in))
        w = jax.random.uniform(kw, (fan_out, fan_in), jnp.float32, -bound, bound)
        b = jax.random.uniform(kb, (fan_out,), jnp.float32, -bound, bound)
        return w, b

    w1, b1 = linear(keys[0], keys[1], IN_FEATS, H1)
    w2, b2 = linear(keys[2], keys[3], H1, H2)
    w3, b3 = linear(keys[4], keys[5], H2, H3)
    w4, b4 = linear(keys[6], keys[7], H3, HOUT)
    return (w1, b1, w2, b2, w3, b3, w4, b4)


def _reference(T, x, params):
    w1, b1, w2, b2, w3, b3, w4, b4 = params
    hp = jax.lax.Precision.HIGHEST
    h = jnp.tanh(T[:, None] * w1[:, 0][None, :]
                 + x[:, None] * w1[:, 1][None, :] + b1[None, :])
    h = jnp.tanh(jnp.dot(h, w2.T, precision=hp) + b2[None, :])
    h = jnp.tanh(jnp.dot(h, w3.T, precision=hp) + b3[None, :])
    return (jnp.dot(h, w4.T, precision=hp) + b4[None, :]).reshape(-1)


if __name__ == "__main__":
    key = jax.random.PRNGKey(0)
    k_params, _ = jax.random.split(key)
    params = init_params(k_params)

    fwd_f32 = jax.jit(functools.partial(dnn_forward, mxu_dtype=jnp.float32))
    fwd_bf16 = jax.jit(functools.partial(dnn_forward, mxu_dtype=jnp.bfloat16))

    # N=16   : single 128-lane block (mostly padding).
    # N=1000 : two 512-lane grid steps with a partial final block.
    # N=5000 : 2048-lane tiles, 4-chunk inner loop, 3 grid steps, partial tail.
    for N in (16, 1000, 5000):
        kT, kx = jax.random.split(jax.random.fold_in(key, N))
        T = jax.random.uniform(kT, (N,), jnp.float32, 250.0, 400.0)
        x = jax.random.uniform(kx, (N,), jnp.float32, 0.0, 1.0)

        ref = _reference(T, x, params)

        out = jax.block_until_ready(fwd_f32(T, x, params))
        assert out.shape == (N,)
        assert jnp.allclose(out, ref, atol=1e-4, rtol=1e-4), (N, out, ref)

        # bf16 MXU-operand path (perf option for v5e/v6e/v7x): looser check.
        out_bf16 = jax.block_until_ready(fwd_bf16(T, x, params))
        assert out_bf16.shape == (N,)
        assert jnp.allclose(out_bf16, ref, atol=5e-2, rtol=5e-2), (N, out_bf16, ref)

    print("KERNEL_OK")
</pallas_src>

<mosaic_0001>
module attributes {stable_mosaic.version = 11 : i64} {
  func.func @kernel(%arg0: i32, %arg1: memref<1x128xf32, #tpu.memory_space<vmem>>, %arg2: memref<1x128xf32, #tpu.memory_space<vmem>>, %arg3: memref<50x2xf32, #tpu.memory_space<vmem>>, %arg4: memref<50x1xf32, #tpu.memory_space<vmem>>, %arg5: memref<50x50xf32, #tpu.memory_space<vmem>>, %arg6: memref<50x1xf32, #tpu.memory_space<vmem>>, %arg7: memref<25x50xf32, #tpu.memory_space<vmem>>, %arg8: memref<25x1xf32, #tpu.memory_space<vmem>>, %arg9: memref<25x1xf32, #tpu.memory_space<vmem>>, %arg10: memref<1x1xf32, #tpu.memory_space<vmem>>, %arg11: memref<1x128xf32, #tpu.memory_space<vmem>>) attributes {dimension_semantics = [#tpu.dimension_semantics<parallel>], iteration_bounds = array<i64: 1>, scalar_prefetch = 0 : i64, scratch_operands = 0 : i64, tpu.core_type = #tpu.core_type<tc>, window_params = [{transform_indices = @transform_0, window_bounds = array<i64: 1, 128>}, {transform_indices = @transform_1, window_bounds = array<i64: 1, 128>}, {pipeline_mode = #tpu.pipeline_mode<synchronous>, transform_indices = @transform_2, window_bounds = array<i64: 50, 2>}, {pipeline_mode = #tpu.pipeline_mode<synchronous>, transform_indices = @transform_3, window_bounds = array<i64: 50, 1>}, {pipeline_mode = #tpu.pipeline_mode<synchronous>, transform_indices = @transform_4, window_bounds = array<i64: 50, 50>}, {pipeline_mode = #tpu.pipeline_mode<synchronous>, transform_indices = @transform_5, window_bounds = array<i64: 50, 1>}, {pipeline_mode = #tpu.pipeline_mode<synchronous>, transform_indices = @transform_6, window_bounds = array<i64: 25, 50>}, {pipeline_mode = #tpu.pipeline_mode<synchronous>, transform_indices = @transform_7, window_bounds = array<i64: 25, 1>}, {pipeline_mode = #tpu.pipeline_mode<synchronous>, transform_indices = @transform_8, window_bounds = array<i64: 25, 1>}, {pipeline_mode = #tpu.pipeline_mode<synchronous>, transform_indices = @transform_9, window_bounds = array<i64: 1, 1>}, {transform_indices = @transform_10, window_bounds = array<i64: 1, 128>}]} {
    %c0 = arith.constant 0 : index
    %c0_0 = arith.constant 0 : index
    %0 = vector.load %arg3[%c0, %c0_0] : memref<50x2xf32, #tpu.memory_space<vmem>>, vector<50x1xf32>
    %c0_1 = arith.constant 0 : index
    %c1 = arith.constant 1 : index
    %1 = vector.load %arg3[%c0_1, %c1] : memref<50x2xf32, #tpu.memory_space<vmem>>, vector<50x1xf32>
    %c0_2 = arith.constant 0 : index
    %c0_3 = arith.constant 0 : index
    %2 = vector.load %arg4[%c0_2, %c0_3] : memref<50x1xf32, #tpu.memory_space<vmem>>, vector<50x1xf32>
    %c0_4 = arith.constant 0 : index
    %c0_5 = arith.constant 0 : index
    %3 = vector.load %arg5[%c0_4, %c0_5] : memref<50x50xf32, #tpu.memory_space<vmem>>, vector<50x50xf32>
    %c0_6 = arith.constant 0 : index
    %c0_7 = arith.constant 0 : index
    %4 = vector.load %arg6[%c0_6, %c0_7] : memref<50x1xf32, #tpu.memory_space<vmem>>, vector<50x1xf32>
    %c0_8 = arith.constant 0 : index
    %c0_9 = arith.constant 0 : index
    %5 = vector.load %arg7[%c0_8, %c0_9] : memref<25x50xf32, #tpu.memory_space<vmem>>, vector<25x50xf32>
    %c0_10 = arith.constant 0 : index
    %c0_11 = arith.constant 0 : index
    %6 = vector.load %arg8[%c0_10, %c0_11] : memref<25x1xf32, #tpu.memory_space<vmem>>, vector<25x1xf32>
    %c0_12 = arith.constant 0 : index
    %c0_13 = arith.constant 0 : index
    %7 = vector.load %arg9[%c0_12, %c0_13] : memref<25x1xf32, #tpu.memory_space<vmem>>, vector<25x1xf32>
    %c0_14 = arith.constant 0 : index
    %c0_15 = arith.constant 0 : index
    %8 = vector.load %arg10[%c0_14, %c0_15] : memref<1x1xf32, #tpu.memory_space<vmem>>, vector<1x1xf32>
    %c0_i32 = arith.constant 0 : i32
    %c128_i32 = arith.constant 128 : i32
    %9 = arith.muli %c0_i32, %c128_i32 : i32
    %10 = tpu.assume_multiple %9, 128 : i32
    %c0_16 = arith.constant 0 : index
    %11 = arith.index_cast %10 : i32 to index
    %12 = vector.load %arg1[%c0_16, %11] : memref<1x128xf32, #tpu.memory_space<vmem>>, vector<1x128xf32>
    %c0_17 = arith.constant 0 : index
    %13 = arith.index_cast %10 : i32 to index
    %14 = vector.load %arg2[%c0_17, %13] : memref<1x128xf32, #tpu.memory_space<vmem>>, vector<1x128xf32>
    %15 = vector.broadcast %0 : vector<50x1xf32> to vector<50x128xf32>
    %16 = vector.broadcast %12 : vector<1x128xf32> to vector<50x128xf32>
    %17 = arith.mulf %15, %16 : vector<50x128xf32>
    %18 = vector.broadcast %1 : vector<50x1xf32> to vector<50x128xf32>
    %19 = vector.broadcast %14 : vector<1x128xf32> to vector<50x128xf32>
    %20 = arith.mulf %18, %19 : vector<50x128xf32>
    %21 = arith.addf %17, %20 : vector<50x128xf32>
    %22 = vector.broadcast %2 : vector<50x1xf32> to vector<50x128xf32>
    %23 = arith.addf %21, %22 : vector<50x128xf32>
    %24 = math.tanh %23 : vector<50x128xf32>
    %cst = arith.constant dense<0.000000e+00> : vector<50x128xf32>
    %25 = tpu.matmul %3, %24, %cst {dimension_numbers = #tpu.dot_dimension_numbers<[1], [0], [0], [1], [0, 0, 1, 1], [], []>} : vector<50x50xf32>, vector<50x128xf32>, vector<50x128xf32> -> vector<50x128xf32>
    %26 = vector.broadcast %4 : vector<50x1xf32> to vector<50x128xf32>
    %27 = arith.addf %25, %26 : vector<50x128xf32>
    %28 = math.tanh %27 : vector<50x128xf32>
    %cst_18 = arith.constant dense<0.000000e+00> : vector<25x128xf32>
    %29 = tpu.matmul %5, %28, %cst_18 {dimension_numbers = #tpu.dot_dimension_numbers<[1], [0], [0], [1], [0, 0, 1, 1], [], []>} : vector<25x50xf32>, vector<50x128xf32>, vector<25x128xf32> -> vector<25x128xf32>
    %30 = vector.broadcast %6 : vector<25x1xf32> to vector<25x128xf32>
    %31 = arith.addf %29, %30 : vector<25x128xf32>
    %32 = math.tanh %31 : vector<25x128xf32>
    %33 = vector.broadcast %7 : vector<25x1xf32> to vector<25x128xf32>
    %34 = arith.mulf %32, %33 : vector<25x128xf32>
    %cst_19 = arith.constant dense<0.000000e+00> : vector<128xf32>
    %35 = vector.multi_reduction <add>, %34, %cst_19 [0] : vector<25x128xf32> to vector<128xf32>
    %36 = vector.shape_cast %35 : vector<128xf32> to vector<1x128xf32>
    %37 = vector.broadcast %8 : vector<1x1xf32> to vector<1x128xf32>
    %38 = arith.addf %36, %37 : vector<1x128xf32>
    %c0_20 = arith.constant 0 : index
    %39 = arith.index_cast %10 : i32 to index
    %40 = vector.load %arg11[%c0_20, %39] : memref<1x128xf32, #tpu.memory_space<vmem>>, vector<1x128xf32>
    tpu.vector_store %arg11[%c0_20, %39], %38 {strides = array<i32>} : memref<1x128xf32, #tpu.memory_space<vmem>>, vector<1x128xf32>,
    %c1_i32 = arith.constant 1 : i32
    return
  }
  func.func @transform_0(%arg0: i32) -> (i32, i32) {
    %c0_i32 = arith.constant 0 : i32
    %c0_i32_0 = arith.constant 0 : i32
    return %c0_i32, %arg0 : i32, i32
  }
  func.func @transform_1(%arg0: i32) -> (i32, i32) {
    %c0_i32 = arith.constant 0 : i32
    %c0_i32_0 = arith.constant 0 : i32
    return %c0_i32, %arg0 : i32, i32
  }
  func.func @transform_2(%arg0: i32) -> (i32, i32) {
    %c0_i32 = arith.constant 0 : i32
    %c0_i32_0 = arith.constant 0 : i32
    %c0_i32_1 = arith.constant 0 : i32
    return %c0_i32, %c0_i32_0 : i32, i32
  }
  func.func @transform_3(%arg0: i32) -> (i32, i32) {
    %c0_i32 = arith.constant 0 : i32
    %c0_i32_0 = arith.constant 0 : i32
    %c0_i32_1 = arith.constant 0 : i32
    return %c0_i32, %c0_i32_0 : i32, i32
  }
  func.func @transform_4(%arg0: i32) -> (i32, i32) {
    %c0_i32 = arith.constant 0 : i32
    %c0_i32_0 = arith.constant 0 : i32
    %c0_i32_1 = arith.constant 0 : i32
    return %c0_i32, %c0_i32_0 : i32, i32
  }
  func.func @transform_5(%arg0: i32) -> (i32, i32) {
    %c0_i32 = arith.constant 0 : i32
    %c0_i32_0 = arith.constant 0 : i32
    %c0_i32_1 = arith.constant 0 : i32
    return %c0_i32, %c0_i32_0 : i32, i32
  }
  func.func @transform_6(%arg0: i32) -> (i32, i32) {
    %c0_i32 = arith.constant 0 : i32
    %c0_i32_0 = arith.constant 0 : i32
    %c0_i32_1 = arith.constant 0 : i32
    return %c0_i32, %c0_i32_0 : i32, i32
  }
  func.func @transform_7(%arg0: i32) -> (i32, i32) {
    %c0_i32 = arith.constant 0 : i32
    %c0_i32_0 = arith.constant 0 : i32
    %c0_i32_1 = arith.constant 0 : i32
    return %c0_i32, %c0_i32_0 : i32, i32
  }
  func.func @transform_8(%arg0: i32) -> (i32, i32) {
    %c0_i32 = arith.constant 0 : i32
    %c0_i32_0 = arith.constant 0 : i32
    %c0_i32_1 = arith.constant 0 : i32
    return %c0_i32, %c0_i32_0 : i32, i32
  }
  func.func @transform_9(%arg0: i32) -> (i32, i32) {
    %c0_i32 = arith.constant 0 : i32
    %c0_i32_0 = arith.constant 0 : i32
    %c0_i32_1 = arith.constant 0 : i32
    return %c0_i32, %c0_i32_0 : i32, i32
  }
  func.func @transform_10(%arg0: i32) -> (i32, i32) {
    %c0_i32 = arith.constant 0 : i32
    %c0_i32_0 = arith.constant 0 : i32
    return %c0_i32, %arg0 : i32, i32
  }
}

</mosaic_0001>

<bundles_post_ra>
// kernel: dnn_forward.1
= control target key start
LH: loop header
LB: loop body
LE: loop exit
PB: predicated region body
PF: predicated region fallthrough
CT: control target
= control target key end

     0   :  { %s973_s0 = inlined_call_operand.vmem [shape: f32[1,16], index: 0, kind: input, shape index: {}]   ;;  %s974_s1 = inlined_call_operand.vmem [shape: f32[1,16], index: 1, kind: input, shape index: {}]   ;;  %s975_s2 = inlined_call_operand.vmem [shape: f32[50,2], index: 2, kind: input, shape index: {}]   ;;  %s976_s3 = inlined_call_operand.vmem [shape: f32[50,1], index: 3, kind: input, shape index: {}]   ;;  %s977_s4 = inlined_call_operand.vmem [shape: f32[50,50], index: 4, kind: input, shape index: {}]   ;;  %s978_s5 = inlined_call_operand.vmem [shape: f32[50,1], index: 5, kind: input, shape index: {}]   ;;  %s979_s6 = inlined_call_operand.vmem [shape: f32[25,50], index: 6, kind: input, shape index: {}]   ;;  %s980_s7 = inlined_call_operand.vmem [shape: f32[25,1], index: 7, kind: input, shape index: {}]   ;;  %s981_s8 = inlined_call_operand.vmem [shape: f32[25,1], index: 8, kind: input, shape index: {}]   ;;  %s982_s9 = inlined_call_operand.<no memory space> [shape: f32[1,1], index: 9, kind: input, shape index: {}]   ;;  %s983_s10 = inlined_call_operand.hbm [shape: f32[1,16], index: 10, kind: output, shape index: {}]  }
   0x1   :  { %v15_v0 = vstv %s982_s9 }
   0x2   :  { %16 = vst [vmem:[#allocation2] sm:$0x1] %v15_v0 }
   0x3   :  { %v44_v1 = vld [vmem:[%s975_s2 + $0x30] sm:$0x3]  ;;  %v43_v2 = vld [vmem:[%s975_s2 + $0x28] sm:$0xff]  ;;  %v746_v3 = vmov 0   ;;  %v41_v4 = vld [vmem:[%s975_s2 + $0x18] sm:$0xff]  ;;  %v747_v5 = vmov 1  }
   0x4   :  { %679 = vset.pattern.permute.xlu1 %v746_v3  ;;  %678 = vset.pattern.permute.xlu0 %v746_v3  ;;  %v40_v6 = vld [vmem:[%s975_s2 + $0x10] sm:$0xff]  ;;  %v42_v7 = vld [vmem:[%s975_s2 + $0x20] sm:$0xff] }
   0x5   :  { %113 = vperm.xlu0 %678, %v44_v1   ;;  %108 = vperm.xlu1 %679, %v43_v2  }
   0x9   :  { %680 = vset.pattern.permute.xlu1 %v747_v5  ;;  %98 = vperm.xlu0 %678, %v41_v4  }
   0xa   :  { %150 = vperm.xlu1 %680, %v43_v2  }
   0xd   :  { %93 = vperm.xlu0 %678, %v40_v6  }
   0xe   :  { %17 = vsyncpa [#allocation4], 0  ;;  %681 = vset.pattern.permute.xlu1 %v746_v3  ;;  %v49_v8 = vld [vmem:[%s976_s3 + $0x20] sm:$0xff]  ;;  %v51_v9 = vld [vmem:[%s976_s3 + $0x30] sm:$0x3]  ;;  %v748_v14 = vmov 0.0  }
   0xf   :  { %103 = vperm.xlu1 %681, %v42_v7   ;;  %v50_v10 = vld [vmem:[%s976_s3 + $0x28] sm:$0xff]  ;;  %v38_v12 = vld [vmem:[%s975_s2] sm:$0xff]  ;;  %618 = vmatprep.subr.mxu0 %v748_v14  ;;  %v48_v15 = vld [vmem:[%s976_s3 + $0x18] sm:$0xff]  ;;  %vm749_vm0 = vmmov 0   ;;  %vm283_vm1 = vcmask 1041408   ;;  %vm261_vm2 = vcmask 408576  }
  0x10   :  { %v39_v11 = vld [vmem:[%s975_s2 + $0x8] sm:$0xff]  ;;  %v62_v17 = vld [vmem:[%s978_s5 + $0x18] sm:$0xff]  ;;  %v47_v19 = vld [vmem:[%s976_s3 + $0x10] sm:$0xff]  ;;  %632 = vmatprep.mubr.msk.f32.mxu0 %vm749_vm0, %v748_v14  ;;  %vm544_vm3 = vcmask 1040384  }
  0x11   :  { %199 = vperm.xlu0 %678, %v49_v8   ;;  %v46_v13 = vld [vmem:[%s976_s3 + $0x8] sm:$0xff]  ;;  %v70_v20 = vld [vmem:[%s980_s7] sm:$0xff]  ;;  %v72_v22 = vld [vmem:[%s980_s7 + $0x10] sm:$0xff] }
  0x12   :  { %v64_v16 = vld [vmem:[%s978_s5 + $0x28] sm:$0xff]  ;;  %v45_v21 = vld [vmem:[%s976_s3] sm:$0xff]  ;;  %v65_v23 = vld [vmem:[%s978_s5 + $0x30] sm:$0x3] }
  0x13   :  { %209 = vperm.xlu1 %681, %v51_v9   ;;  %v60_v18 = vld [vmem:[%s978_s5 + $0x8] sm:$0xff]  ;;  %v74_v24 = vld [vmem:[%s981_s8] sm:$0xff]  ;;  %v76_v26 = vld [vmem:[%s981_s8 + $0x10] sm:$0xff] }
  0x14   :  { %v63_v25 = vld [vmem:[%s978_s5 + $0x20] sm:$0xff]  ;;  %v61_v27 = vld [vmem:[%s978_s5 + $0x10] sm:$0xff]  ;;  %v71_v30 = vld [vmem:[%s980_s7 + $0x8] sm:$0xff] }
  0x15   :  { %685 = vset.pattern.permute.xlu0 %v747_v5  ;;  %v78_v28 = vld [vmem:[#allocation2] sm:$0x1]  ;;  %v73_v31 = vld [vmem:[%s980_s7 + $0x18] sm:$0x1]  ;;  %v75_v32 = vld [vmem:[%s981_s8 + $0x8] sm:$0xff] }
  0x16   :  { %154 = vperm.xlu0 %685, %v44_v1   ;;  %v59_v29 = vld [vmem:[%s978_s5] sm:$0xff]  ;;  %v77_v33 = vld [vmem:[%s981_s8 + $0x18] sm:$0x1] }
  0x17   :  { %682 = vset.pattern.permute.xlu1 %v747_v5  ;;  %v579_v42 = vld [vmem:[%s974_s1] ss:$0 sm:$0xff] }
  0x18   :  { %142 = vperm.xlu1 %682, %v41_v4   ;;  %v578_v43 = vld [vmem:[%s973_s0] ss:$0 sm:$0xff] }
  0x1a   :  { %146 = vperm.xlu0 %685, %v42_v7  }
  0x1c   :  { %683 = vset.pattern.permute.xlu1 %v746_v3 }
  0x1d   :  { %204 = vperm.xlu1 %683, %v50_v10  }
  0x1e   :  { %134 = vperm.xlu0 %685, %v39_v11  }
  0x21   :  { %684 = vset.pattern.permute.xlu1 %v747_v5 }
  0x22   :  { %138 = vperm.xlu1 %684, %v40_v6   ;;  %130 = vperm.xlu0 %685, %v38_v12  }
  0x26   :  { %686 = vset.pattern.permute.xlu1 %v746_v3  ;;  %687 = vset.pattern.permute.xlu0 %v746_v3 }
  0x27   :  { %88 = vperm.xlu1 %686, %v39_v11   ;;  %184 = vperm.xlu0 %687, %v46_v13  }
  0x2b   :  { %194 = vperm.xlu1 %686, %v48_v15   ;;  %253 = vperm.xlu0 %687, %v64_v16  }
  0x2f   :  { %243 = vperm.xlu0 %687, %v62_v17   ;;  %83 = vperm.xlu1 %686, %v38_v12  }
  0x33   :  { %233 = vperm.xlu0 %687, %v60_v18   ;;  %189 = vperm.xlu1 %686, %v47_v19  }
  0x37   :  { %396 = vperm.xlu0 %687, %v70_v20   ;;  %179 = vperm.xlu1 %686, %v45_v21  }
  0x3b   :  { %406 = vperm.xlu0 %687, %v72_v22   ;;  %258 = vperm.xlu1 %686, %v65_v23  }
  0x3f   :  { %520 = vperm.xlu0 %687, %v74_v24   ;;  %248 = vperm.xlu1 %686, %v63_v25  }
  0x43   :  { %530 = vperm.xlu0 %687, %v76_v26   ;;  %238 = vperm.xlu1 %686, %v61_v27  }
  0x47   :  { %555 = vperm.xlu0 %687, %v78_v28   ;;  %228 = vperm.xlu1 %686, %v59_v29   ;;  %v52_v28 = vld [vmem:[%s977_s4] sm:$0xff] }
  0x4b   :  { %401 = vperm.xlu1 %686, %v71_v30   ;;  %v53_v30 = vld [vmem:[%s977_s4 + $0x8] sm:$0xff] }
  0x4f   :  { %411 = vperm.xlu1 %686, %v73_v31   ;;  %v54_v31 = vld [vmem:[%s977_s4 + $0x10] sm:$0xff] }
  0x53   :  { %525 = vperm.xlu1 %686, %v75_v32   ;;  %v55_v32 = vld [vmem:[%s977_s4 + $0x18] sm:$0xff] }
  0x57   :  { %535 = vperm.xlu1 %686, %v77_v33   ;;  %v56_v33 = vld [vmem:[%s977_s4 + $0x20] sm:$0xff] }
  0x80   :  { %v109_v34 = vpop.permute.xlu1 %108  ;;  %v114_v35 = vpop.permute.xlu0 %113 }
  0x81   :  { %v128_v45 = vmul.f32 %v578_v43, %v114_v35  ;;  %v127_v50 = vmul.f32 %v578_v43, %v109_v34  ;;  %v57_v34 = vld [vmem:[%s977_s4 + $0x28] sm:$0xff]  ;;  %v58_v35 = vld [vmem:[%s977_s4 + $0x30] sm:$0x3] }
  0x84   :  { %v99_v36 = vpop.permute.xlu0 %98 }
  0x85   :  { %v151_v37 = vpop.permute.xlu1 %150  ;;  %v125_v0 = vmul.f32 %v578_v43, %v99_v36  ;;  %v66_v36 = vld [vmem:[%s979_s6] sm:$0xff] }
  0x86   :  { %v168_v47 = vmul.f32 %v579_v42, %v151_v37  ;;  %667 = vmatprep.mubr.msk.f32.mxu1 %vm261_vm2, %v66_v36 }
  0x88   :  { %v94_v38 = vpop.permute.xlu0 %93  ;;  %v175_v55 = vadd.f32 %v168_v47, %v127_v50 }
  0x89   :  { %v124_v12 = vmul.f32 %v578_v43, %v94_v38 }
  0x8a   :  { %v104_v39 = vpop.permute.xlu1 %103 }
  0x8b   :  { %v126_v52 = vmul.f32 %v578_v43, %v104_v39 }
  0x8c   :  { %v200_v40 = vpop.permute.xlu0 %199 }
  0x8e   :  { %v210_v41 = vpop.permute.xlu1 %209 }
  0x91   :  { %v155_v44 = vpop.permute.xlu0 %154 }
  0x92   :  { %v169_v46 = vmul.f32 %v579_v42, %v155_v44 }
  0x93   :  { %v143_v48 = vpop.permute.xlu1 %142 }
  0x94   :  { %v176_v49 = vadd.f32 %v169_v46, %v128_v45  ;;  %v166_v61 = vmul.f32 %v579_v42, %v143_v48 }
  0x95   :  { %v147_v51 = vpop.permute.xlu0 %146 }
  0x96   :  { %v218_v53 = vadd.f32 %v210_v41, %v176_v49  ;;  %v167_v54 = vmul.f32 %v579_v42, %v147_v51  ;;  %v173_v2 = vadd.f32 %v166_v61, %v125_v0 }
  0x98   :  { %688 = vtanh.f32 %v218_v53  ;;  %v174_v56 = vadd.f32 %v167_v54, %v126_v52  ;;  %v205_v57 = vpop.permute.xlu1 %204 }
  0x99   :  { %v217_v58 = vadd.f32 %v205_v57, %v175_v55  ;;  %v135_v62 = vpop.permute.xlu0 %134 }
  0x9a   :  { %v216_v59 = vadd.f32 %v200_v40, %v174_v56  ;;  %v164_v9 = vmul.f32 %v579_v42, %v135_v62 }
  0x9b   :  { %690 = vtanh.f32 %v217_v58 }
  0x9c   :  { %692 = vtanh.f32 %v216_v59 }
  0x9d   :  { %v139_v60 = vpop.permute.xlu1 %138  ;;  %v131_v7 = vpop.permute.xlu0 %130 }
  0x9e   :  { %v165_v10 = vmul.f32 %v579_v42, %v139_v60  ;;  %v163_v19 = vmul.f32 %v579_v42, %v131_v7  ;;  %v67_v7 = vld [vmem:[%s979_s6 + $0x8] sm:$0xff] }
  0xa0   :  { %v172_v16 = vadd.f32 %v165_v10, %v124_v12 }
  0xa2   :  { %v89_v63 = vpop.permute.xlu1 %88  ;;  %v185_v17 = vpop.permute.xlu0 %184 }
  0xa3   :  { %v123_v4 = vmul.f32 %v578_v43, %v89_v63 }
  0xa5   :  { %v689_v1 = vpop.eup %688  ;;  %v171_v13 = vadd.f32 %v164_v9, %v123_v4  ;;  %v69_v9 = vld [vmem:[%s979_s6 + $0x18] sm:$0x1] }
  0xa6   :  { %619 = vmatpush3.msk.msra.mxu0 %vm283_vm1, %v689_v1  ;;  %v195_v3 = vpop.permute.xlu1 %194  ;;  %v254_v47 = vpop.permute.xlu0 %253 }
  0xa7   :  { %v215_v5 = vadd.f32 %v195_v3, %v173_v2  ;;  %620 = vmatprep.subr.mxu0 %v748_v14  ;;  %v213_v20 = vadd.f32 %v185_v17, %v171_v13 }
  0xa8   :  { %v691_v6 = vpop.eup %690 }
  0xa9   :  { %v693_v8 = vpop.eup %692  ;;  %621 = vmatpush3.msra.mxu0 %v691_v6  ;;  %694 = vtanh.f32 %v215_v5 }
  0xaa   :  { %622 = vmatprep.subr.mxu0 %v748_v14  ;;  %v84_v11 = vpop.permute.xlu1 %83  ;;  %v244_v54 = vpop.permute.xlu0 %243 }
  0xab   :  { %623 = vmatpush3.msra.mxu0 %v693_v8  ;;  %v122_v15 = vmul.f32 %v578_v43, %v84_v11  ;;  %v68_v8 = vld [vmem:[%s979_s6 + $0x10] sm:$0xff]  ;;  %s750_s6 = smov [#allocation3]  }
  0xac   :  { %624 = vmatprep.subr.mxu0 %v748_v14  ;;  %s570_s24 = sshll.u32 %s750_s6, 4  ;;  %s571_s24 = int_to_ptr.vmem [resolvable:$true] %s570_s24 }
  0xad   :  { %v170_v22 = vadd.f32 %v163_v19, %v122_v15  ;;  %s724_s5 = scalar_lea.vmem %s571_s24, 16  ;;  %s728_s25 = scalar_lea.vmem %s571_s24, 32 }
  0xae   :  { %v190_v18 = vpop.permute.xlu1 %189  ;;  %v234_v60 = vpop.permute.xlu0 %233  ;;  %p725_p0 = scmp.ne.s32.totalorder %s571_s24, %s724_s5  ;;  %p729_p1 = scmp.lt.s32.totalorder %s571_s24, %s571_s24 }
  0xaf   :  { %v214_v21 = vadd.f32 %v190_v18, %v172_v16  ;;  %p730_p2 = scmp.lt.s32.totalorder %s728_s25, %s724_s5 }
  0xb1   :  { %696 = vtanh.f32 %v214_v21  ;;  %p731_p3 = por %p730_p2, %p729_p1 }
  0xb2   :  { %v180_v23 = vpop.permute.xlu1 %179  ;;  %698 = vtanh.f32 %v213_v20  ;;  %v397_v11 = vpop.permute.xlu0 %396 }
  0xb3   :  { %v212_v24 = vadd.f32 %v180_v23, %v170_v22  ;;  %p732_p4 = pnand %p731_p3, %p725_p0 }
  0xb5   :  { %700 = vtanh.f32 %v212_v24 }
  0xb6   :  { %v695_v25 = vpop.eup %694  ;;  %v259_v44 = vpop.permute.xlu1 %258 }
  0xb7   :  { %625 = vmatpush3.msra.mxu0 %v695_v25  ;;  %v407_v20 = vpop.permute.xlu0 %406 }
  0xb8   :  { %626 = vmatprep.subr.mxu0 %v748_v14 }
  0xba   :  { %v249_v49 = vpop.permute.xlu1 %248 }
  0xbb   :  { %v521_v24 = vpop.permute.xlu0 %520 }
  0xbe   :  { %v697_v26 = vpop.eup %696  ;;  %v239_v57 = vpop.permute.xlu1 %238 }
  0xbf   :  { %627 = vmatpush3.msra.mxu0 %v697_v26  ;;  %v699_v27 = vpop.eup %698 }
  0xc0   :  { %628 = vmatprep.subr.mxu0 %v748_v14 }
  0xc1   :  { %629 = vmatpush3.msra.mxu0 %v699_v27 }
  0xc2   :  { %v701_v29 = vpop.eup %700  ;;  %630 = vmatprep.subr.mxu0 %v748_v14  ;;  %v229_v62 = vpop.permute.xlu1 %228 }
  0xc3   :  { %631 = vmatpush3.msra.mxu0 %v701_v29 }
  0xc4   :  { %633 = vmatmul.mubr.msk.f32.vlgmr.msra.gmra.mxu0 %vm261_vm2, %v52_v28 }
  0xc5   :  { %635 = vmatprep.mubr.msk.f32.mxu0 %vm749_vm0, %v748_v14 }
  0xc6   :  { %v402_v10 = vpop.permute.xlu1 %401 }
  0xc8   :  { %636 = vmatmul.mubr.msk.f32.gmra.mxu0 %vm261_vm2, %v53_v30 }
  0xc9   :  { %638 = vmatprep.mubr.msk.f32.mxu0 %vm749_vm0, %v748_v14 }
  0xca   :  { %v412_v17 = vpop.permute.xlu1 %411 }
  0xcc   :  { %639 = vmatmul.mubr.msk.f32.gmra.mxu0 %vm261_vm2, %v54_v31 }
  0xcd   :  { %641 = vmatprep.mubr.msk.f32.mxu0 %vm749_vm0, %v748_v14 }
  0xce   :  { %v526_v23 = vpop.permute.xlu1 %525 }
  0xd0   :  { %642 = vmatmul.mubr.msk.f32.gmra.mxu0 %vm261_vm2, %v55_v32  ;;  %v531_v32 = vpop.permute.xlu0 %530 }
  0xd1   :  { %644 = vmatprep.mubr.msk.f32.mxu0 %vm749_vm0, %v748_v14 }
  0xd2   :  { %v536_v29 = vpop.permute.xlu1 %535 }
  0xd4   :  { %645 = vmatmul.mubr.msk.f32.gmra.mxu0 %vm261_vm2, %v56_v33 }
  0xd5   :  { %647 = vmatprep.mubr.msk.f32.mxu0 %vm749_vm0, %v748_v14 }
  0xd8   :  { %648 = vmatmul.mubr.msk.f32.gmra.mxu0 %vm261_vm2, %v57_v34 }
  0xd9   :  { %650 = vmatprep.mubr.msk.f32.mxu0 %vm749_vm0, %v748_v14 }
  0xdc   :  { %651 = vmatmul.mubr.msk.f32.gmra.mxu0 %vm261_vm2, %v58_v35 }
 0x184   :  { %v353_v37 = vpop.f32.mrf.mxu0 }
 0x185   :  { %v354_v63 = vadd.f32 %v353_v37, %v229_v62 }
 0x186   :  { %v634_v38 = vpop.f32.mrf.mxu0 }
 0x187   :  { %v558_v38 = vlaneseq }
 0x188   :  { %v358_v39 = vpop.f32.mrf.mxu0 }
 0x189   :  { %v359_v61 = vadd.f32 %v358_v39, %v234_v60 }
 0x18a   :  { %v637_v40 = vpop.f32.mrf.mxu0 }
 0x18c   :  { %v363_v41 = vpop.f32.mrf.mxu0 }
 0x18d   :  { %v364_v59 = vadd.f32 %v363_v41, %v239_v57  ;;  %v559_v41 = vshrl.u32 %v558_v38, 7 }
 0x18e   :  { %v640_v42 = vpop.f32.mrf.mxu0 }
 0x190   :  { %v368_v43 = vpop.f32.mrf.mxu0 }
 0x191   :  { %v369_v58 = vadd.f32 %v368_v43, %v244_v54 }
 0x192   :  { %v643_v14 = vpop.f32.mrf.mxu0 }
 0x193   :  { %v560_v14 = vsub.s32 0, %v559_v41 }
 0x194   :  { %v373_v45 = vpop.f32.mrf.mxu0 }
 0x195   :  { %v374_v56 = vadd.f32 %v373_v45, %v249_v49  ;;  %v556_v45 = vpop.permute.xlu0 %555 }
 0x196   :  { %v646_v46 = vpop.f32.mrf.mxu0 }
 0x198   :  { %v378_v48 = vpop.f32.mrf.mxu0 }
 0x199   :  { %v379_v52 = vadd.f32 %v378_v48, %v254_v47  ;;  %v561_v47 = vrot.slane %v556_v45, %v560_v14 }
 0x19a   :  { %v649_v50 = vpop.f32.mrf.mxu0 }
 0x19c   :  { %v383_v51 = vpop.f32.mrf.mxu0 }
 0x19d   :  { %v384_v53 = vadd.f32 %v383_v51, %v259_v44 }
 0x19e   :  { %v652_v55 = vpop.f32.mrf.mxu0 }
 0x19f   :  { %702 = vtanh.f32 %v384_v53 }
 0x1a0   :  { %704 = vtanh.f32 %v379_v52 }
 0x1a1   :  { %706 = vtanh.f32 %v374_v56 }
 0x1a2   :  { %708 = vtanh.f32 %v369_v58 }
 0x1a3   :  { %710 = vtanh.f32 %v364_v59 }
 0x1a4   :  { %712 = vtanh.f32 %v359_v61 }
 0x1a5   :  { %714 = vtanh.f32 %v354_v63 }
 0x1ac   :  { %v703_v0 = vpop.eup %702 }
 0x1ad   :  { %653 = vmatprep.subr.msk.mxu1 %vm283_vm1, %v703_v0  ;;  %v705_v1 = vpop.eup %704 }
 0x1ae   :  { %654 = vmatpush3.msk.msra.mxu1 %vm283_vm1, %v703_v0  ;;  %v707_v2 = vpop.eup %706 }
 0x1af   :  { %655 = vmatprep.subr.mxu1 %v705_v1  ;;  %v709_v3 = vpop.eup %708 }
 0x1b0   :  { %656 = vmatpush3.msra.mxu1 %v705_v1  ;;  %v711_v4 = vpop.eup %710 }
 0x1b1   :  { %657 = vmatprep.subr.mxu1 %v707_v2  ;;  %v713_v5 = vpop.eup %712 }
 0x1b2   :  { %658 = vmatpush3.msra.mxu1 %v707_v2  ;;  %v715_v6 = vpop.eup %714 }
 0x1b3   :  { %659 = vmatprep.subr.mxu1 %v709_v3 }
 0x1b4   :  { %660 = vmatpush3.msra.mxu1 %v709_v3 }
 0x1b5   :  { %661 = vmatprep.subr.mxu1 %v711_v4 }
 0x1b6   :  { %662 = vmatpush3.msra.mxu1 %v711_v4 }
 0x1b7   :  { %663 = vmatprep.subr.mxu1 %v713_v5 }
 0x1b8   :  { %664 = vmatpush3.msra.mxu1 %v713_v5 }
 0x1b9   :  { %665 = vmatprep.subr.mxu1 %v715_v6 }
 0x1ba   :  { %666 = vmatpush3.msra.mxu1 %v715_v6 }
 0x1bb   :  { %668 = vmatmul.mubr.msk.f32.vlgmr.msra.gmra.mxu1 %vm261_vm2, %v67_v7 }
 0x1bc   :  { %670 = vmatprep.mubr.msk.f32.mxu1 %vm261_vm2, %v68_v8 }
 0x1bf   :  { %671 = vmatmul.mubr.msk.f32.gmra.mxu1 %vm261_vm2, %v69_v9 }
 0x27b   :  { %v669_v12 = vpop.f32.mrf.mxu1 }
 0x27c   :  { %v501_v13 = vadd.f32 %v669_v12, %v402_v10 }
 0x27d   :  { %v495_v15 = vpop.f32.mrf.mxu1 }
 0x27e   :  { %v496_v16 = vadd.f32 %v495_v15, %v397_v11  ;;  %716 = vtanh.f32 %v501_v13 }
 0x27f   :  { %v672_v18 = vpop.f32.mrf.mxu1 }
 0x280   :  { %718 = vtanh.f32 %v496_v16  ;;  %v511_v19 = vadd.f32 %v672_v18, %v412_v17 }
 0x281   :  { %v505_v21 = vpop.f32.mrf.mxu1 }
 0x282   :  { %720 = vtanh.f32 %v511_v19  ;;  %v506_v22 = vadd.f32 %v505_v21, %v407_v20 }
 0x284   :  { %722 = vtanh.f32 %v506_v22 }
 0x28b   :  { %v717_v25 = vpop.eup %716 }
 0x28c   :  { %v539_v30 = vmul.f32 %v717_v25, %v526_v23 }
 0x28d   :  { %v719_v26 = vpop.eup %718 }
 0x28e   :  { %v538_v27 = vmul.f32 %v719_v26, %v521_v24 }
 0x28f   :  { %v721_v28 = vpop.eup %720 }
 0x290   :  { %v541_v33 = vmul.f32 %v721_v28, %v536_v29  ;;  %v542_v35 = vadd.f32 %v539_v30, %v538_v27 }
 0x291   :  { %v723_v31 = vpop.eup %722 }
 0x292   :  { %v540_v34 = vmul.f32 %v723_v31, %v531_v32  ;;  %v545_v37 = vsel %vm544_vm3, %v541_v33, 0.0 }
 0x294   :  { %v543_v36 = vadd.f32 %v542_v35, %v540_v34 }
 0x296   :  { %v546_v39 = vadd.f32 %v545_v37, %v543_v36 }
 0x298   :  { %v547_v40 = vrot.slane %v546_v39, 4 }
 0x29a   :  { %v548_v42 = vadd.f32 %v547_v40, %v546_v39 }
 0x29c   :  { %v549_v43 = vrot.slane %v548_v42, 2 }
 0x29e   :  { %v550_v44 = vadd.f32 %v549_v43, %v548_v42 }
 0x2a0   :  { %v551_v46 = vrot.slane %v550_v44, 1 }
 0x2a2   :  { %v552_v48 = vadd.f32 %v551_v46, %v550_v44 }
 0x2a4   :  { %v562_v49 = vadd.f32 %v561_v47, %v552_v48 }
 0x2a6   :  { %563 = vst [vmem:[#allocation3] sm:$0x1] %v562_v49 }
 0x2a7   :  { %735 = shalt.err (!%p732_p4)
}
 0x2a8   :  { %573 = dma.vmem_to_hbm [thread:$0]  %s571_s24, 16, %s983_s10, [#allocation4]  }
 0x2a9   :  { %744 = dma.done.wait [#allocation4], 16  }
 0x2aa   :  { %745 = vsyncadd [#allocation4], 4294967280 }
 0x2ab   :  { %577 = vsyncpa [#allocation4], 1 }

</bundles_post_ra>
